<compile_context>
chip_gen: v6e
topology: v6e:2x2x1
jax: 0.10.0
libtpu: 0.0.40
codegen_flags: <defaults>
</compile_context>

<pallas_src>
import jax
import jax.numpy as jnp
from jax.experimental import pallas as pl
from jax.experimental.pallas import tpu as pltpu


def glu_kernel(x_ref, o_ref):
    # x_ref: (2, Ct, Tt) VMEM tile -- half 0 = outputs, half 1 = gate.
    # o_ref: (Ct, Tt).
    a = x_ref[0].astype(jnp.float32)
    g = x_ref[1].astype(jnp.float32)
    # sigmoid(g) = 0.5*(tanh(g/2)+1): single EUP transcendental per element.
    sig = 0.5 * (jnp.tanh(0.5 * g) + 1.0)
    o_ref[...] = (a * sig).astype(o_ref.dtype)


_LANE = 128
_STEP_BUDGET_BYTES = 4 << 20  # ~4 MiB moved per grid step (2 in halves + 1 out)


def _choose_tiles(C, T, itemsize):
    """Pick (Ct, Tt) tile sizes for a (C, T) output slab."""
    sub = 8 if itemsize >= 4 else 16          # sublane packing (f32: 8, bf16: 16)
    per_row_bytes = 3 * T * itemsize          # 2 input halves + 1 output, per channel row

    # Lane (time) axis: prefer a full contiguous row (longest HBM bursts).
    if T <= _LANE or per_row_bytes * sub <= _STEP_BUDGET_BYTES:
        Tt = T                                 # full dim always satisfies the 128 rule
    else:
        tt = (_STEP_BUDGET_BYTES // (3 * itemsize * sub)) // _LANE * _LANE
        Tt = max(_LANE, min(tt, (T // _LANE) * _LANE))

    # Sublane (channel) axis: as big as the budget allows, multiple of `sub`,
    # capped so there are plenty of grid steps for pipelining / megacore.
    max_ct = _STEP_BUDGET_BYTES // (3 * Tt * itemsize)
    Ct = min(C, max(sub, (max_ct // sub) * sub), 512)
    # Ct is now either == C (full dim) or a multiple of `sub`; both satisfy the
    # (8, 128) block rule.
    return Ct, Tt


def glu(x, *, block_c=None, block_t=None):
    """GLU along dim=1 of a (B, 2C, T) array (conformer conv-module usage)."""
    B, C2, T = x.shape
    assert C2 % 2 == 0, "channel dim must be even for GLU"
    C = C2 // 2
    itemsize = jnp.dtype(x.dtype).itemsize

    # Free contiguous view: (B, 2C, T) -> (B, 2, C, T); half 0 = outputs,
    # half 1 = gate (matches torch.chunk(2, dim=1) ordering).
    x4 = x.reshape(B, 2, C, T)

    Ct, Tt = _choose_tiles(C, T, itemsize)
    if block_c is not None:
        Ct = block_c
    if block_t is not None:
        Tt = block_t

    # cdiv grid: boundary blocks (C % Ct or T % Tt != 0) are masked by Pallas,
    # so non-aligned shapes still get many pipelined, lane-dense grid steps.
    grid = (B, pl.cdiv(C, Ct), pl.cdiv(T, Tt))

    # Single input stream carrying both halves; kernel splits with ref[0]/ref[1].
    in_spec = pl.BlockSpec((None, 2, Ct, Tt), lambda b, ci, ti: (b, 0, ci, ti))
    out_spec = pl.BlockSpec((None, Ct, Tt), lambda b, ci, ti: (b, ci, ti))

    # VMEM limit derived from the actual tiles: per-step bytes, double-buffered
    # by the pipeline, plus headroom.  Comfortably inside v7x's 64 MiB.
    step_bytes = 3 * Ct * Tt * itemsize
    vmem_limit = int(min(64 << 20, max(4 << 20, 3 * step_bytes + (2 << 20))))

    # TODO(synk): if xprof shows exposed DMA at step boundaries on v7x, add
    # pipeline_mode=pl.Buffered(3) to in_spec.
    return pl.pallas_call(
        glu_kernel,
        out_shape=jax.ShapeDtypeStruct((B, C, T), x.dtype),
        grid_spec=pltpu.PrefetchScalarGridSpec(
            num_scalar_prefetch=0,
            grid=grid,
            in_specs=[in_spec],
            out_specs=out_spec,
        ),
        compiler_params=pltpu.CompilerParams(
            dimension_semantics=("parallel", "parallel", "parallel"),
            vmem_limit_bytes=vmem_limit,
        ),
    )(x4)


def _reference(x):
    a, g = jnp.split(x, 2, axis=1)
    out = a.astype(jnp.float32) * jax.nn.sigmoid(g.astype(jnp.float32))
    return out.astype(x.dtype)


if __name__ == "__main__":
    key = jax.random.PRNGKey(0)
    k1, k2, k3 = jax.random.split(key, 3)

    # 1) Small f32 shape consistent with the conformer conv module: (B, 2C, T).
    x1 = jax.random.normal(k1, (2, 8, 16), dtype=jnp.float32)
    o1 = jax.block_until_ready(glu(x1))
    assert o1.shape == (2, 4, 16)
    assert jnp.allclose(o1, _reference(x1), atol=1e-5, rtol=1e-5)

    # 2) Non-aligned C/T with forced small tiles: exercises the cdiv grid with
    #    masked boundary blocks on both tiled axes.
    x2 = jax.random.normal(k2, (2, 48, 300), dtype=jnp.float32)
    o2 = jax.block_until_ready(glu(x2, block_c=16, block_t=128))
    assert o2.shape == (2, 24, 300)
    assert jnp.allclose(o2, _reference(x2), atol=1e-5, rtol=1e-5)

    # 3) bf16 case: validates the 16-sublane packing path.
    x3 = jax.random.normal(k3, (2, 64, 384), dtype=jnp.bfloat16)
    o3 = jax.block_until_ready(glu(x3))
    assert o3.shape == (2, 32, 384)
    assert jnp.allclose(o3.astype(jnp.float32),
                        _reference(x3).astype(jnp.float32),
                        atol=2e-2, rtol=2e-2)

    print("KERNEL_OK")
</pallas_src>

<mosaic_0001>
module attributes {stable_mosaic.version = 11 : i64} {
  func.func @glu_kernel(%arg0: i32, %arg1: i32, %arg2: i32, %arg3: memref<1x2x4x16xf32, #tpu.memory_space<vmem>>, %arg4: memref<1x4x16xf32, #tpu.memory_space<vmem>>) attributes {dimension_semantics = [#tpu.dimension_semantics<parallel>, #tpu.dimension_semantics<parallel>, #tpu.dimension_semantics<parallel>], iteration_bounds = array<i64: 2, 1, 1>, scalar_prefetch = 0 : i64, scratch_operands = 0 : i64, tpu.core_type = #tpu.core_type<tc>, window_params = [{transform_indices = @transform_0, window_bounds = array<i64: 1, 2, 4, 16>}, {transform_indices = @transform_1, window_bounds = array<i64: 1, 4, 16>}]} {
    %c0 = arith.constant 0 : index
    %c0_0 = arith.constant 0 : index
    %c0_1 = arith.constant 0 : index
    %c0_2 = arith.constant 0 : index
    %0 = vector.load %arg3[%c0, %c0_0, %c0_1, %c0_2] : memref<1x2x4x16xf32, #tpu.memory_space<vmem>>, vector<1x1x4x16xf32>
    %1 = vector.shape_cast %0 : vector<1x1x4x16xf32> to vector<4x16xf32>
    %c0_3 = arith.constant 0 : index
    %c1 = arith.constant 1 : index
    %c0_4 = arith.constant 0 : index
    %c0_5 = arith.constant 0 : index
    %2 = vector.load %arg3[%c0_3, %c1, %c0_4, %c0_5] : memref<1x2x4x16xf32, #tpu.memory_space<vmem>>, vector<1x1x4x16xf32>
    %3 = vector.shape_cast %2 : vector<1x1x4x16xf32> to vector<4x16xf32>
    %cst = arith.constant 5.000000e-01 : f32
    %4 = vector.broadcast %cst : f32 to vector<4x16xf32>
    %5 = arith.mulf %4, %3 : vector<4x16xf32>
    %6 = math.tanh %5 : vector<4x16xf32>
    %cst_6 = arith.constant 1.000000e+00 : f32
    %7 = vector.broadcast %cst_6 : f32 to vector<4x16xf32>
    %8 = arith.addf %6, %7 : vector<4x16xf32>
    %cst_7 = arith.constant 5.000000e-01 : f32
    %9 = vector.broadcast %cst_7 : f32 to vector<4x16xf32>
    %10 = arith.mulf %9, %8 : vector<4x16xf32>
    %11 = arith.mulf %1, %10 : vector<4x16xf32>
    %c0_8 = arith.constant 0 : index
    %c0_9 = arith.constant 0 : index
    %c0_10 = arith.constant 0 : index
    %12 = vector.load %arg4[%c0_8, %c0_9, %c0_10] : memref<1x4x16xf32, #tpu.memory_space<vmem>>, vector<1x4x16xf32>
    %13 = vector.shape_cast %12 : vector<1x4x16xf32> to vector<4x16xf32>
    %14 = vector.shape_cast %11 : vector<4x16xf32> to vector<1x4x16xf32>
    tpu.vector_store %arg4[%c0_8, %c0_9, %c0_10], %14 {strides = array<i32>} : memref<1x4x16xf32, #tpu.memory_space<vmem>>, vector<1x4x16xf32>,
    return
  }
  func.func @transform_0(%arg0: i32, %arg1: i32, %arg2: i32) -> (i32, i32, i32, i32) {
    %c0_i32 = arith.constant 0 : i32
    %c0_i32_0 = arith.constant 0 : i32
    return %arg0, %c0_i32, %arg1, %arg2 : i32, i32, i32, i32
  }
  func.func @transform_1(%arg0: i32, %arg1: i32, %arg2: i32) -> (i32, i32, i32) {
    %c0_i32 = arith.constant 0 : i32
    return %arg0, %arg1, %arg2 : i32, i32, i32
  }
}

</mosaic_0001>

<bundles_post_ra>
// kernel: tpu_custom_call.1
= control target key start
LH: loop header
LB: loop body
LE: loop exit
PB: predicated region body
PF: predicated region fallthrough
CT: control target
= control target key end

     0   :  { %6 = vsyncpa [#allocation3], 0  ;;  %s615_s0 = inlined_call_operand.hbm [shape: f32[2,2,4,16], index: 0, kind: input, shape index: {}]   ;;  %s616_s1 = inlined_call_operand.hbm [shape: f32[2,4,16], index: 1, kind: output, shape index: {}]  }
   0x1   :  { %8 = vsyncpa [#allocation3 + $0x1], 0 }
   0x2   :  { %9 = vsyncpa [#allocation4], 0 }
   0x3   :  { %11 = vsyncpa [#allocation4 + $0x1], 0  ;;  %s482_s6 = smov 0   ;;  %s484_s7 = smov 0  }
   0x4   :  { %s486_s8 = smov 0   ;;  %s488_s9 = smov 0  }
   0x5   :  { %s490_s10 = smov 0   ;;  %s492_s11 = smov 0  }
   0x6 LB: > { %s276_s12 = sadd.s32 4294967295, %s466_s11   ;;  %s277_s13 = sadd.s32 4294967294, %s466_s11   ;;  %s466_s11 = sphi %s492_s11, %s17_s11   ;;  %s462_s10 = sphi %s490_s10, %s627_s10   ;;  %s458_s9 = sphi %s488_s9, %s626_s9   ;;  %s454_s8 = sphi %s486_s8, %s625_s8   ;;  %s450_s7 = sphi %s484_s7, %s624_s7   ;;  %s446_s6 = sphi %s482_s6, %s623_s6  }
   0x7   : > { %s36_s14 = sadd.s32 1, %s462_s10  ;;  %s47_s15 = sadd.s32 1, %s454_s8 }
   0x8   : > { %p38_p0 = scmp.ge.s32.totalorder %s36_s14, 2  ;;  %p54_p1 = scmp.ne.s32.totalorder %s454_s8, %s450_s7 }
   0x9   : > { %p55_p2 = scmp.eq.s32.totalorder %s466_s11, 0  ;;  %p60_p3 = scmp.ne.s32.totalorder %s450_s7, %s446_s6 }
   0xa   : > { %s629_s14 = smov (%p38_p0, %s36_s14), 0  ;;  %p61_p5 = scmp.eq.s32.totalorder %s276_s12, 0 }
   0xb   : > { %p523_p4 = por %p55_p2, %p54_p1  ;;  %s40_s17 = ssub.s32 %s462_s10, %s629_s14 }
   0xc   : > { %p88_p6 = scmp.eq.s32.totalorder %s276_s12, 1  ;;  %p45_p7 = scmp.eq.s32.totalorder %s40_s17, 0 }
   0xd   : > { %p529_p8 = por %p61_p5, %p60_p3  ;;  %p94_p10 = scmp.eq.s32.totalorder %s277_s13, 1 }
   0xe   : > { %p533_p9 = por %p88_p6, %p54_p1  ;;  %p304_p13 = scmp.lt.s32.totalorder %s466_s11, 2 }
   0xf   : > { %s538_s20 = scalar_select %p45_p7, %s454_s8, %s47_s15  }
  0x10   : > { %p540_p11 = por %p94_p10, %p60_p3  ;;  %s114_s22 = sand.u32 1, %s454_s8  }
  0x11   : > { %s280_s23 = sshll.u32 %s114_s22, 3  ;;  %s291_s24 = sshll.u32 %s462_s10, 7 }
  0x12   : > { %s126_s27 = scalar_lea.hbm %s615_s0, %s291_s24  ;;  %s118_s28 = scalar_lea.vmem [#allocation2], %s280_s23 }
  0x13   : > { %s127_s29 = sshll.u32 %s118_s28, 4  ;;  %p553_p0 = pnand %p304_p13, %p523_p4  ;;  %s128_s29 = int_to_ptr.vmem [resolvable:$true] %s127_s29 }
  0x14   : > { %p283_p1 = scmp.ge.s32.totalorder %s466_s11, 1  ;;  %s115_s2 = scalar_lea.sflag [#allocation3], %s114_s22 }
  0x15   : > { %p360_p2 = pneg %p553_p0  ;;  %s371_s3 = scalar_lea.vmem %s128_s29, 128 }
  0x16   : > { %p372_p3 = scmp.ne.s32.totalorder %s128_s29, %s371_s3  ;;  %s468_s4 = smov [#allocation2]  }
  0x17   : > { %s376_s5 = sshll.u32 %s468_s4, 4  ;;  %s377_s5 = int_to_ptr.vmem [resolvable:$false] %s376_s5 }
  0x18   : > { %p374_p5 = pnand %p372_p3, %p360_p2  ;;  %s378_s12 = scalar_lea.vmem %s377_s5, 256 }
  0x19   : > { %p379_p7 = scmp.lt.s32.totalorder %s128_s29, %s377_s5  ;;  %p380_p10 = scmp.lt.s32.totalorder %s378_s12, %s371_s3 }
  0x1a   : > { %p375_p6 = pneg %p374_p5 }
  0x1b   : > { %p381_p12 = por %p380_p10, %p379_p7 }
  0x1d   : > { %p382_p4 = pnand %p381_p12, %p375_p6 }
  0x1f   : > { %385 = shalt.err (!%p382_p4)
}
  0x20   : > { %s469_s13 = smov 64   ;;  %s470_s15 = smov 4  }
  0x21   : > { %299 = dma.hbm_to_vmem [thread:$0]  (!%p553_p0), %s126_s27, 128, %s128_s29, %s115_s2, %s469_s13, %s469_s13, %s470_s15  }
  0x22   : > { %p135_p13 = scmp.lt.s32.totalorder %s466_s11, 3 }
  0x24   : > { %p136_p2 = pnand %p283_p1, %p135_p13 }
  0x25   : > { %s566_s16 = sand.u32 (!%p136_p2), 1, %s450_s7  }
  0x26   : > { %139 = sbr.rel (%p136_p2) target bundleno = 80 (0x50), region = 24  ;;  %s284_s17 = sshll.u32 (!%p136_p2), %s566_s16, 3 }
  0x27   : > { %s142_s22 = scalar_lea.sflag (!%p136_p2), [#allocation3], %s566_s16  ;;  %s145_s23 = scalar_lea.vmem (!%p136_p2), [#allocation2], %s284_s17 }
  0x2b   : > { %437 = dma.done.wait (%p529_p8), %s142_s22, 128  }
  0x2c   : > { %439 = vsyncadd (%p529_p8), %s142_s22, 4294967168  ;;  %v286_v0 = vld [vmem:[%s145_s23 + $0x4] sm:$0xf]  ;;  %s285_s24 = sshll.u32 %s566_s16, 2  ;;  %v164_v4 = vld [vmem:[%s145_s23] sm:$0xf] }
  0x2d   : > { %v167_v1 = vmul.f32 0.5, %v286_v0  ;;  %s163_s25 = scalar_lea.vmem [#allocation5], %s285_s24  ;;  %s288_s27 = sshll.u32 %s458_s9, 6  ;;  %vm172_vm0 = vcmask 125952  }
  0x2e   : > { %s190_s26 = sshll.u32 %s163_s25, 4  ;;  %s188_s29 = scalar_lea.hbm %s616_s1, %s288_s27  ;;  %s191_s26 = int_to_ptr.vmem [resolvable:$true] %s190_s26 }
  0x2f   : > { %356 = vtanh.f32 %v167_v1  ;;  %s175_s30 = scalar_lea.sflag [#allocation4], %s566_s16  ;;  %s386_s2 = scalar_lea.vmem %s191_s26, 64 }
  0x30   : > { %p387_p8 = scmp.ne.s32.totalorder %s191_s26, %s386_s2  ;;  %s471_s3 = smov [#allocation5]  }
  0x31   : > { %s390_s4 = sshll.u32 %s471_s3, 4  ;;  %s391_s4 = int_to_ptr.vmem [resolvable:$false] %s390_s4 }
  0x32   : > { %p388_p12 = pnand %p387_p8, %p533_p9  ;;  %s392_s5 = scalar_lea.vmem %s391_s4, 128 }
  0x33   : > { %p393_p1 = scmp.lt.s32.totalorder %s191_s26, %s391_s4  ;;  %p394_p3 = scmp.lt.s32.totalorder %s392_s5, %s386_s2 }
  0x34   : > { %p389_p0 = pneg %p388_p12 }
  0x35   : > { %p395_p5 = por %p394_p3, %p393_p1 }
  0x37   : > { %p396_p6 = pnand %p395_p5, %p389_p0 }
  0x3c   : > { %v357_v2 = vpop.eup %356 }
  0x3d   : > { %v169_v3 = vadd.f32 1.0, %v357_v2 }
  0x3f   : > { %v170_v5 = vmul.f32 0.5, %v169_v3 }
  0x41   : > { %v171_v6 = vmul.f32 %v170_v5, %v164_v4 }
  0x43   : > { %173 = vst.msk [vmem:[%s163_s25] sm:$0xf] %vm172_vm0, %v171_v6 }
  0x44   : > { %399 = shalt.err (!%p396_p6)
}
  0x45   : > { %s400_s9 = scalar_lea.hbm %s188_s29, 64  ;;  %s404_s15 = scalar_lea.hbm %s616_s1, 128 }
  0x46   : > { %p401_p7 = scmp.ne.s32.totalorder %s188_s29, %s400_s9  ;;  %p405_p13 = scmp.lt.s32.totalorder %s188_s29, %s616_s1 }
  0x47   : > { %p406_p2 = scmp.lt.s32.totalorder %s404_s15, %s400_s9 }
  0x48   : > { %p402_p10 = pnand %p401_p7, %p533_p9 }
  0x49   : > { %p407_p8 = por %p406_p2, %p405_p13 }
  0x4a   : > { %p403_p4 = pneg %p402_p10 }
  0x4c   : > { %p408_p12 = pnand %p407_p8, %p403_p4 }
  0x4e   : > { %411 = shalt.err (!%p408_p12)
}
  0x4f   : > { %294 = dma.vmem_to_hbm [thread:$0]  (%p533_p9), %s191_s26, 64, %s188_s29, %s175_s30  }
  0x50 PF: > { %s202_s22 = sand.u32 1, %s446_s6   ;;  %p622_p0 = scmp.ge.s32.totalorder %s466_s11, 2 }
  0x51   : > { %s203_s23 = scalar_lea.sflag [#allocation4], %s202_s22 }
  0x52   : > { %p301_p1 = pnand %p622_p0, %p540_p11 }
  0x54   : > { %p302_p3 = pneg %p301_p1 }
  0x56   : > { %441 = dma.done.wait (%p302_p3), %s203_s23, 64  }
  0x57   : > { %443 = vsyncadd (%p302_p3), %s203_s23, 4294967232  ;;  %s17_s11 = sadd.s32 1, %s466_s11   ;;  %s623_s6 = smov %s450_s7 }
  0x58   : > { %p14_p5 = scmp.ge.s32.totalorder %s17_s11, 4   ;;  %s624_s7 = smov %s454_s8 }
  0x59   : > { %s625_s8 = smov %s538_s20  ;;  %s626_s9 = smov %s462_s10 }
  0x5a   : > { %s627_s10 = smov %s629_s14  ;;  %16 = sbr.rel (!%p14_p5) target bundleno = 6 (0x6), region = 70 }
  0x5f   :  { %208 = vsyncpa [#allocation3], 1 }
  0x60   :  { %210 = vsyncpa [#allocation3 + $0x1], 1 }
  0x61   :  { %211 = vsyncpa [#allocation4], 1 }
  0x62   :  { %213 = vsyncpa [#allocation4 + $0x1], 1 }

</bundles_post_ra>
